<compile_context>
chip_gen: v7x
topology: tpu7x:2x2x1
jax: 0.10.0
libtpu: 0.0.40
codegen_flags: <defaults>
</compile_context>

<pallas_src>
import jax
import jax.numpy as jnp
from jax.experimental import pallas as pl
from jax.experimental.pallas import tpu as pltpu


def _round_up(n, m):
    return ((n + m - 1) // m) * m


def critic_kernel(x_ref, w1_ref, b1_ref, w2_ref, b2_ref, w3_ref, b3_ref, out_ref):
    # hidden layer 1: Linear + Tanh  (bf16 MXU inputs, f32 accumulation)
    x = x_ref[...].astype(jnp.bfloat16)
    h = jnp.tanh(
        jnp.dot(x, w1_ref[...], preferred_element_type=jnp.float32) + b1_ref[...]
    )
    # hidden layer 2: Linear + Tanh
    h = jnp.tanh(
        jnp.dot(h.astype(jnp.bfloat16), w2_ref[...],
                preferred_element_type=jnp.float32) + b2_ref[...]
    )
    # critic head: logits over the (padded) c*c axis; pad lanes carry bias -1e30
    logits = (
        jnp.dot(h.astype(jnp.bfloat16), w3_ref[...],
                preferred_element_type=jnp.float32) + b3_ref[...]
    )
    # softmax over the last axis == torch softmax(dim=1) on the 2-D tensor.
    # Pad lanes: exp(-1e30 - m) == 0, so the denominator is unchanged.
    m = jnp.max(logits, axis=-1, keepdims=True)
    e = jnp.exp(logits - m)
    denom = jnp.sum(e, axis=-1, keepdims=True)
    out_ref[...] = e * pl.reciprocal(denom, approx=True)


def critic_forward(x, params, c):
    """x: (B, nS) float32  ->  (B, c, c) float32 (softmax probs over c*c)."""
    w1, b1, w2, b2, w3, b3 = params
    B, nS = x.shape
    cc = c * c
    hp = w1.shape[1]     # padded hidden width (64)
    ccp = w3.shape[1]    # padded logits width (128)

    # Batch tile: multiple of 8 (sublane), capped so double-buffered x/out tiles
    # comfortably fit v7x's smaller (64 MiB physical / 32 MiB scoped) VMEM.
    TB = min(512, _round_up(B, 8))
    Bp = _round_up(B, TB)
    if Bp != B:
        x = jnp.pad(x, ((0, Bp - B), (0, 0)))

    resident = lambda i: (0, 0)   # weights/biases: DMA'd once, VMEM-resident
    probs = pl.pallas_call(
        critic_kernel,
        out_shape=jax.ShapeDtypeStruct((Bp, ccp), jnp.float32),
        grid=(Bp // TB,),
        in_specs=[
            pl.BlockSpec((TB, nS), lambda i: (i, 0)),   # x tile
            pl.BlockSpec((nS, hp), resident),           # w1
            pl.BlockSpec((1, hp), resident),            # b1
            pl.BlockSpec((hp, hp), resident),           # w2
            pl.BlockSpec((1, hp), resident),            # b2
            pl.BlockSpec((hp, ccp), resident),          # w3
            pl.BlockSpec((1, ccp), resident),           # b3
        ],
        out_specs=pl.BlockSpec((TB, ccp), lambda i: (i, 0)),
        compiler_params=pltpu.CompilerParams(
            dimension_semantics=("parallel",)),
    )(x, w1, b1, w2, b2, w3, b3)

    return probs[:B, :cc].reshape(B, c, c)


def init_params(key, nS, c, hidden=50):
    """Deterministic init mimicking torch.nn.Linear default
    (U[-1/sqrt(fan_in), 1/sqrt(fan_in)]) on the *real* (unpadded) slices.

    Layout:
      * weights stored as (in_features, out_features), bf16, zero-padded to
        hidden=64 and logits=128 lane-dense widths.
      * biases (1, out_features), f32; pad lanes of the final bias are -1e30 so
        the padded logits vanish under softmax.
    """
    cc = c * c
    hp = _round_up(hidden, 64)   # 50 -> 64
    ccp = _round_up(cc, 128)     # 121 -> 128

    def linear(key, fan_in, fan_out, pad_in, pad_out, pad_bias_val=0.0):
        kw, kb = jax.random.split(key)
        bound = 1.0 / jnp.sqrt(fan_in)
        w = jax.random.uniform(kw, (fan_in, fan_out), jnp.float32, -bound, bound)
        b = jax.random.uniform(kb, (1, fan_out), jnp.float32, -bound, bound)
        wp = jnp.zeros((pad_in, pad_out), jnp.float32).at[:fan_in, :fan_out].set(w)
        bp = jnp.full((1, pad_out), pad_bias_val, jnp.float32).at[:, :fan_out].set(b)
        return wp, bp

    k1, k2, k3 = jax.random.split(key, 3)
    w1, b1 = linear(k1, nS, hidden, nS, hp)
    w2, b2 = linear(k2, hidden, hidden, hp, hp)
    w3, b3 = linear(k3, hidden, cc, hp, ccp, pad_bias_val=-1e30)
    return (w1.astype(jnp.bfloat16), b1,
            w2.astype(jnp.bfloat16), b2,
            w3.astype(jnp.bfloat16), b3)


def _reference_forward(x, params, c):
    """Pure-JAX reference on the same (padded) params, for a sanity check."""
    w1, b1, w2, b2, w3, b3 = params
    h = jnp.tanh(x @ w1.astype(jnp.float32) + b1)
    h = jnp.tanh(h @ w2.astype(jnp.float32) + b2)
    logits = h @ w3.astype(jnp.float32) + b3
    probs = jax.nn.softmax(logits, axis=-1)
    return probs[:, : c * c].reshape(-1, c, c)


if __name__ == "__main__":
    nS = 32   # state dimension (small)
    c = 11    # module default -> c*c = 121 logits
    B = 8     # small batch

    key = jax.random.PRNGKey(0)
    kx, kp = jax.random.split(key)
    x = jax.random.normal(kx, (B, nS), dtype=jnp.float32)
    params = init_params(kp, nS, c)

    out = jax.block_until_ready(critic_forward(x, params, c))

    # sanity: shape (B, c, c), rows sum to ~1 (approx reciprocal => loose atol),
    # non-negative probs, and agreement with a pure-JAX reference.
    assert out.shape == (B, c, c)
    sums = jnp.sum(out.reshape(B, c * c), axis=-1)
    assert jnp.allclose(sums, jnp.ones((B,), jnp.float32), atol=5e-3), sums
    assert bool(jnp.all(out >= 0.0))
    ref = _reference_forward(x, params, c)
    assert bool(jnp.max(jnp.abs(out - ref)) < 1e-2)

    print("KERNEL_OK")
</pallas_src>

<mosaic_0001>
module attributes {stable_mosaic.version = 11 : i64} {
  func.func @critic_kernel(%arg0: i32, %arg1: memref<8x32xf32, #tpu.memory_space<vmem>>, %arg2: memref<32x64xbf16, #tpu.memory_space<vmem>>, %arg3: memref<1x64xf32, #tpu.memory_space<vmem>>, %arg4: memref<64x64xbf16, #tpu.memory_space<vmem>>, %arg5: memref<1x64xf32, #tpu.memory_space<vmem>>, %arg6: memref<64x128xbf16, #tpu.memory_space<vmem>>, %arg7: memref<1x128xf32, #tpu.memory_space<vmem>>, %arg8: memref<8x128xf32, #tpu.memory_space<vmem>>) attributes {dimension_semantics = [#tpu.dimension_semantics<parallel>], iteration_bounds = array<i64: 1>, scalar_prefetch = 0 : i64, scratch_operands = 0 : i64, tpu.core_type = #tpu.core_type<tc>, window_params = [{transform_indices = @transform_0, window_bounds = array<i64: 8, 32>}, {pipeline_mode = #tpu.pipeline_mode<synchronous>, transform_indices = @transform_1, window_bounds = array<i64: 32, 64>}, {pipeline_mode = #tpu.pipeline_mode<synchronous>, transform_indices = @transform_2, window_bounds = array<i64: 1, 64>}, {pipeline_mode = #tpu.pipeline_mode<synchronous>, transform_indices = @transform_3, window_bounds = array<i64: 64, 64>}, {pipeline_mode = #tpu.pipeline_mode<synchronous>, transform_indices = @transform_4, window_bounds = array<i64: 1, 64>}, {pipeline_mode = #tpu.pipeline_mode<synchronous>, transform_indices = @transform_5, window_bounds = array<i64: 64, 128>}, {pipeline_mode = #tpu.pipeline_mode<synchronous>, transform_indices = @transform_6, window_bounds = array<i64: 1, 128>}, {transform_indices = @transform_7, window_bounds = array<i64: 8, 128>}]} {
    %c0 = arith.constant 0 : index
    %c0_0 = arith.constant 0 : index
    %0 = vector.load %arg1[%c0, %c0_0] : memref<8x32xf32, #tpu.memory_space<vmem>>, vector<8x32xf32>
    %1 = arith.truncf %0 : vector<8x32xf32> to vector<8x32xbf16>
    %c0_1 = arith.constant 0 : index
    %c0_2 = arith.constant 0 : index
    %2 = vector.load %arg2[%c0_1, %c0_2] : memref<32x64xbf16, #tpu.memory_space<vmem>>, vector<32x64xbf16>
    %cst = arith.constant dense<0.000000e+00> : vector<8x64xf32>
    %3 = tpu.matmul %1, %2, %cst {dimension_numbers = #tpu.dot_dimension_numbers<[1], [0], [0], [1], [0, 0, 1, 1], [], []>} : vector<8x32xbf16>, vector<32x64xbf16>, vector<8x64xf32> -> vector<8x64xf32>
    %c0_3 = arith.constant 0 : index
    %c0_4 = arith.constant 0 : index
    %4 = vector.load %arg3[%c0_3, %c0_4] : memref<1x64xf32, #tpu.memory_space<vmem>>, vector<1x64xf32>
    %5 = vector.broadcast %4 : vector<1x64xf32> to vector<8x64xf32>
    %6 = arith.addf %3, %5 : vector<8x64xf32>
    %7 = math.tanh %6 : vector<8x64xf32>
    %8 = arith.truncf %7 : vector<8x64xf32> to vector<8x64xbf16>
    %c0_5 = arith.constant 0 : index
    %c0_6 = arith.constant 0 : index
    %9 = vector.load %arg4[%c0_5, %c0_6] : memref<64x64xbf16, #tpu.memory_space<vmem>>, vector<64x64xbf16>
    %cst_7 = arith.constant dense<0.000000e+00> : vector<8x64xf32>
    %10 = tpu.matmul %8, %9, %cst_7 {dimension_numbers = #tpu.dot_dimension_numbers<[1], [0], [0], [1], [0, 0, 1, 1], [], []>} : vector<8x64xbf16>, vector<64x64xbf16>, vector<8x64xf32> -> vector<8x64xf32>
    %c0_8 = arith.constant 0 : index
    %c0_9 = arith.constant 0 : index
    %11 = vector.load %arg5[%c0_8, %c0_9] : memref<1x64xf32, #tpu.memory_space<vmem>>, vector<1x64xf32>
    %12 = vector.broadcast %11 : vector<1x64xf32> to vector<8x64xf32>
    %13 = arith.addf %10, %12 : vector<8x64xf32>
    %14 = math.tanh %13 : vector<8x64xf32>
    %15 = arith.truncf %14 : vector<8x64xf32> to vector<8x64xbf16>
    %c0_10 = arith.constant 0 : index
    %c0_11 = arith.constant 0 : index
    %16 = vector.load %arg6[%c0_10, %c0_11] : memref<64x128xbf16, #tpu.memory_space<vmem>>, vector<64x128xbf16>
    %cst_12 = arith.constant dense<0.000000e+00> : vector<8x128xf32>
    %17 = tpu.matmul %15, %16, %cst_12 {dimension_numbers = #tpu.dot_dimension_numbers<[1], [0], [0], [1], [0, 0, 1, 1], [], []>} : vector<8x64xbf16>, vector<64x128xbf16>, vector<8x128xf32> -> vector<8x128xf32>
    %c0_13 = arith.constant 0 : index
    %c0_14 = arith.constant 0 : index
    %18 = vector.load %arg7[%c0_13, %c0_14] : memref<1x128xf32, #tpu.memory_space<vmem>>, vector<1x128xf32>
    %19 = vector.broadcast %18 : vector<1x128xf32> to vector<8x128xf32>
    %20 = arith.addf %17, %19 : vector<8x128xf32>
    %cst_15 = arith.constant dense<0xFF800000> : vector<8xf32>
    %21 = vector.multi_reduction <maximumf>, %20, %cst_15 [1] : vector<8x128xf32> to vector<8xf32>
    %22 = vector.shape_cast %21 : vector<8xf32> to vector<8x1xf32>
    %23 = vector.broadcast %22 : vector<8x1xf32> to vector<8x128xf32>
    %24 = arith.subf %20, %23 : vector<8x128xf32>
    %25 = math.exp %24 : vector<8x128xf32>
    %cst_16 = arith.constant dense<0.000000e+00> : vector<8xf32>
    %26 = vector.multi_reduction <add>, %25, %cst_16 [1] : vector<8x128xf32> to vector<8xf32>
    %27 = vector.shape_cast %26 : vector<8xf32> to vector<8x1xf32>
    %28 = tpu.reciprocal %27 {approx = true} : vector<8x1xf32> -> vector<8x1xf32>
    %29 = vector.broadcast %28 : vector<8x1xf32> to vector<8x128xf32>
    %30 = arith.mulf %25, %29 : vector<8x128xf32>
    %c0_17 = arith.constant 0 : index
    %c0_18 = arith.constant 0 : index
    %31 = vector.load %arg8[%c0_17, %c0_18] : memref<8x128xf32, #tpu.memory_space<vmem>>, vector<8x128xf32>
    tpu.vector_store %arg8[%c0_17, %c0_18], %30 {strides = array<i32>} : memref<8x128xf32, #tpu.memory_space<vmem>>, vector<8x128xf32>,
    return
  }
  func.func @transform_0(%arg0: i32) -> (i32, i32) {
    %c0_i32 = arith.constant 0 : i32
    %c0_i32_0 = arith.constant 0 : i32
    return %arg0, %c0_i32 : i32, i32
  }
  func.func @transform_1(%arg0: i32) -> (i32, i32) {
    %c0_i32 = arith.constant 0 : i32
    %c0_i32_0 = arith.constant 0 : i32
    %c0_i32_1 = arith.constant 0 : i32
    return %c0_i32, %c0_i32_0 : i32, i32
  }
  func.func @transform_2(%arg0: i32) -> (i32, i32) {
    %c0_i32 = arith.constant 0 : i32
    %c0_i32_0 = arith.constant 0 : i32
    %c0_i32_1 = arith.constant 0 : i32
    return %c0_i32, %c0_i32_0 : i32, i32
  }
  func.func @transform_3(%arg0: i32) -> (i32, i32) {
    %c0_i32 = arith.constant 0 : i32
    %c0_i32_0 = arith.constant 0 : i32
    %c0_i32_1 = arith.constant 0 : i32
    return %c0_i32, %c0_i32_0 : i32, i32
  }
  func.func @transform_4(%arg0: i32) -> (i32, i32) {
    %c0_i32 = arith.constant 0 : i32
    %c0_i32_0 = arith.constant 0 : i32
    %c0_i32_1 = arith.constant 0 : i32
    return %c0_i32, %c0_i32_0 : i32, i32
  }
  func.func @transform_5(%arg0: i32) -> (i32, i32) {
    %c0_i32 = arith.constant 0 : i32
    %c0_i32_0 = arith.constant 0 : i32
    %c0_i32_1 = arith.constant 0 : i32
    return %c0_i32, %c0_i32_0 : i32, i32
  }
  func.func @transform_6(%arg0: i32) -> (i32, i32) {
    %c0_i32 = arith.constant 0 : i32
    %c0_i32_0 = arith.constant 0 : i32
    %c0_i32_1 = arith.constant 0 : i32
    return %c0_i32, %c0_i32_0 : i32, i32
  }
  func.func @transform_7(%arg0: i32) -> (i32, i32) {
    %c0_i32 = arith.constant 0 : i32
    %c0_i32_0 = arith.constant 0 : i32
    return %arg0, %c0_i32 : i32, i32
  }
}

</mosaic_0001>

<bundles_post_ra>
// kernel: tpu_custom_call.1
= control target key start
LH: loop header
LB: loop body
LE: loop exit
PB: predicated region body
PF: predicated region fallthrough
CT: control target
= control target key end

     0   :  { %12 = vsyncpa [#allocation3], 0  ;;  %s681_s0 = inlined_call_operand.hbm [shape: f32[8,32], index: 0, kind: input, shape index: {}]   ;;  %s682_s1 = inlined_call_operand.hbm [shape: bf16[32,64], index: 1, kind: input, shape index: {}]   ;;  %s683_s2 = inlined_call_operand.vmem [shape: f32[1,64], index: 2, kind: input, shape index: {}]   ;;  %s684_s3 = inlined_call_operand.hbm [shape: bf16[64,64], index: 3, kind: input, shape index: {}]   ;;  %s685_s4 = inlined_call_operand.vmem [shape: f32[1,64], index: 4, kind: input, shape index: {}]   ;;  %s686_s5 = inlined_call_operand.hbm [shape: bf16[64,128], index: 5, kind: input, shape index: {}]   ;;  %s687_s6 = inlined_call_operand.vmem [shape: f32[1,128], index: 6, kind: input, shape index: {}]   ;;  %s688_s7 = inlined_call_operand.hbm [shape: f32[8,128], index: 7, kind: output, shape index: {}]  }
   0x1   :  { %13 = vsyncpa [#allocation6], 0 }
   0x2   :  { %14 = vsyncpa [#allocation9], 0 }
   0x3   :  { %15 = vsyncpa [#allocation4], 0  ;;  %s552_s24 = smov [#allocation5]   ;;  %s434_s28 = scalar_lea.hbm %s682_s1, 256 }
   0x4   :  { %s31_s25 = sshll.u32 %s552_s24, 4  ;;  %p435_p0 = scmp.ne.s32.totalorder %s682_s1, %s434_s28  ;;  %s32_s25 = int_to_ptr.vmem [resolvable:$true] %s31_s25 }
   0x5   :  { %p438_p1 = scmp.lt.u32.totalorder %s434_s28, %s682_s1 }
   0x7   :  { %p440_p2 = pnand %p438_p1, %p435_p0 }
   0x9   :  { %443 = shalt.err (!%p440_p2)
}
   0xa   :  { %s444_s10 = scalar_lea.vmem %s32_s25, 256  ;;  %p449_p4 = scmp.lt.s32.totalorder %s32_s25, %s32_s25 }
   0xb   :  { %p445_p3 = scmp.ne.s32.totalorder %s32_s25, %s444_s10  ;;  %p450_p5 = scmp.lt.s32.totalorder %s444_s10, %s444_s10 }
   0xd   :  { %p451_p6 = por %p450_p5, %p449_p4 }
   0xf   :  { %p452_p7 = pnand %p451_p6, %p445_p3 }
  0x11   :  { %455 = shalt.err (!%p452_p7)
}
  0x12   :  { %s553_s11 = smov 64   ;;  %s554_s12 = smov 4  }
  0x13   :  { %37 = dma.hbm_to_vmem [thread:$0]  %s682_s1, 256, %s32_s25, [#allocation6], %s553_s11, %s553_s11, %s554_s12  }
  0x14   :  { %s555_s15 = smov [#allocation2]   ;;  %s556_s17 = smov [#allocation7]  }
  0x15   :  { %s22_s16 = sshll.u32 %s555_s15, 4  ;;  %s45_s18 = sshll.u32 %s556_s17, 4  ;;  %s23_s16 = int_to_ptr.vmem [resolvable:$true] %s22_s16  ;;  %s46_s18 = int_to_ptr.vmem [resolvable:$true] %s45_s18 }
  0x16   :  { %s456_s21 = scalar_lea.hbm %s681_s0, 128 }
  0x17   :  { %p457_p8 = scmp.ne.s32.totalorder %s681_s0, %s456_s21  ;;  %p460_p9 = scmp.lt.u32.totalorder %s456_s21, %s681_s0 }
  0x19   :  { %p462_p10 = pnand %p460_p9, %p457_p8 }
  0x1b   :  { %465 = shalt.err (!%p462_p10)
}
  0x1c   :  { %s466_s1 = scalar_lea.vmem %s23_s16, 128  ;;  %p471_p12 = scmp.lt.s32.totalorder %s23_s16, %s23_s16 }
  0x1d   :  { %p467_p11 = scmp.ne.s32.totalorder %s23_s16, %s466_s1  ;;  %p472_p13 = scmp.lt.s32.totalorder %s466_s1, %s466_s1 }
  0x1f   :  { %p473_p0 = por %p472_p13, %p471_p12 }
  0x21   :  { %p474_p1 = pnand %p473_p0, %p467_p11 }
  0x23   :  { %477 = shalt.err (!%p474_p1)
}
  0x24   :  { %25 = dma.hbm_to_vmem [thread:$0]  %s681_s0, 128, %s23_s16, [#allocation3]  }
  0x25   :  { %s478_s30 = scalar_lea.hbm %s684_s3, 512 }
  0x26   :  { %p479_p2 = scmp.ne.s32.totalorder %s684_s3, %s478_s30  ;;  %p482_p3 = scmp.lt.u32.totalorder %s478_s30, %s684_s3 }
  0x28   :  { %p484_p4 = pnand %p482_p3, %p479_p2 }
  0x2a   :  { %487 = shalt.err (!%p484_p4)
}
  0x2b   :  { %s488_s14 = scalar_lea.vmem %s46_s18, 512  ;;  %p493_p6 = scmp.lt.s32.totalorder %s46_s18, %s46_s18 }
  0x2c   :  { %p489_p5 = scmp.ne.s32.totalorder %s46_s18, %s488_s14  ;;  %p494_p7 = scmp.lt.s32.totalorder %s488_s14, %s488_s14 }
  0x2e   :  { %p495_p8 = por %p494_p7, %p493_p6 }
  0x30   :  { %p496_p9 = pnand %p495_p8, %p489_p5 }
  0x32   :  { %499 = shalt.err (!%p496_p9)
}
  0x33   :  { %51 = dma.hbm_to_vmem [thread:$0]  %s684_s3, 512, %s46_s18, [#allocation6], %s553_s11, %s553_s11, %s554_s12  }
  0x34   :  { %s557_s16 = smov [#allocation8]   ;;  %s500_s21 = scalar_lea.hbm %s686_s5, 512 }
  0x35   :  { %s59_s17 = sshll.u32 %s557_s16, 4  ;;  %p501_p10 = scmp.ne.s32.totalorder %s686_s5, %s500_s21  ;;  %s60_s17 = int_to_ptr.vmem [resolvable:$true] %s59_s17 }
  0x36   :  { %p504_p11 = scmp.lt.u32.totalorder %s500_s21, %s686_s5 }
  0x38   :  { %p506_p12 = pnand %p504_p11, %p501_p10 }
  0x3a   :  { %509 = shalt.err (!%p506_p12)
}
  0x3b   :  { %s510_s1 = scalar_lea.vmem %s60_s17, 512  ;;  %p515_p0 = scmp.lt.s32.totalorder %s60_s17, %s60_s17 }
  0x3c   :  { %p511_p13 = scmp.ne.s32.totalorder %s60_s17, %s510_s1  ;;  %p516_p1 = scmp.lt.s32.totalorder %s510_s1, %s510_s1 }
  0x3e   :  { %p517_p2 = por %p516_p1, %p515_p0 }
  0x40   :  { %p518_p3 = pnand %p517_p2, %p511_p13 }
  0x42   :  { %521 = shalt.err (!%p518_p3)
}
  0x43   :  { %65 = dma.hbm_to_vmem [thread:$0]  %s686_s5, 512, %s60_s17, [#allocation9], %s553_s11, %s553_s11, %s554_s12  }
  0x44   :  { %544 = dma.done.wait [#allocation3], 128  }
  0x45   :  { %545 = vsyncadd [#allocation3], 4294967168 }
  0x46   :  { %546 = dma.done.wait [#allocation6], 768  }
  0x47   :  { %547 = vsyncadd [#allocation6], 4294966528 }
  0x48   :  { %548 = dma.done.wait [#allocation9], 512  }
  0x49   :  { %549 = vsyncadd [#allocation9], 4294966784  ;;  %v558_v0 = vmov 0.0   ;;  %vm559_vm0 = vmmov 0   ;;  %v416_v1 = vld [vmem:[#allocation5] sm:$0xff]   ;;  %v417_v2 = vld [vmem:[#allocation5 + $0x8] sm:$0xff]  }
  0x4a   :  { %375 = vmatprep.subr.bf16.mxu0 %v558_v0  ;;  %379 = vmatprep.mubr.msk.bf16.mxu0 %vm559_vm0, %v558_v0  ;;  %v81_v3 = vld [vmem:[#allocation2] sm:$0xff]  ;;  %vm106_vm1 = vcmask 261120   ;;  %v418_v5 = vld [vmem:[#allocation7] sm:$0xff]   ;;  %v420_v7 = vld [vmem:[#allocation7 + $0x10] sm:$0xff]   ;;  %vm191_vm2 = vcmask 523264  }
  0x4b   :  { %383 = vmatprep.subr.bf16.mxu1 %v558_v0  ;;  %391 = vmatprep.mubr.msk.bf16.mxu1 %vm559_vm0, %v558_v0  ;;  %v82_v4 = vpack.c.bf16 %v81_v3, %v81_v3  ;;  %v419_v6 = vld [vmem:[#allocation7 + $0x8] sm:$0xff]   ;;  %v421_v8 = vld [vmem:[#allocation7 + $0x18] sm:$0xff]   ;;  %v422_v17 = vld [vmem:[#allocation8] sm:$0xff]  }
  0x4c   :  { %376 = vmatpush3.bf16.msra.mxu0 %v416_v1  ;;  %384 = vmatpush3.bf16.msra.mxu1 %v418_v5  ;;  %v346_v9 = vld [vmem:[%s683_s2] ss:$0 sm:$0xff]  ;;  %v424_v19 = vld [vmem:[#allocation8 + $0x10] sm:$0xff]   ;;  %v425_v20 = vld [vmem:[#allocation8 + $0x18] sm:$0xff]  }
  0x4d   :  { %377 = vmatprep.subr.bf16.mxu0 %v558_v0  ;;  %385 = vmatprep.subr.bf16.mxu1 %v558_v0  ;;  %v423_v18 = vld [vmem:[#allocation8 + $0x8] sm:$0xff]  }
  0x4e   :  { %v350_v21 = vld [vmem:[%s685_s4] ss:$0 sm:$0xff]  ;;  %s560_s4 = smov [#allocation10]  }
  0x4f   :  { %v356_v29 = vld [vmem:[%s687_s6] ss:$0 sm:$0xff]  ;;  %s335_s28 = sshll.u32 %s560_s4, 4  ;;  %s336_s28 = int_to_ptr.vmem [resolvable:$true] %s335_s28 }
  0x50   :  { %378 = vmatpush3.bf16.msra.mxu0 %v417_v2  ;;  %386 = vmatpush3.bf16.msra.mxu1 %v419_v6  ;;  %s522_s6 = scalar_lea.vmem %s336_s28, 128  ;;  %p527_p5 = scmp.lt.s32.totalorder %s336_s28, %s336_s28 }
  0x51   :  { %395 = vmatprep.subr.bf16.mxu0 %v558_v0  ;;  %387 = vmatprep.subr.bf16.mxu1 %v558_v0  ;;  %p523_p4 = scmp.ne.s32.totalorder %s336_s28, %s522_s6  ;;  %p528_p6 = scmp.lt.s32.totalorder %s522_s6, %s522_s6 }
  0x53   :  { %380 = vmatmul.mubr.msk.bf16.vlgmr.msra.gmra.mrb[0].mxu0 %vm106_vm1, %v82_v4  ;;  %p529_p7 = por %p528_p6, %p527_p5 }
  0x54   :  { %403 = vmatprep.mubr.msk.bf16.mxu0 %vm559_vm0, %v558_v0  ;;  %388 = vmatpush3.bf16.msra.mxu1 %v420_v7 }
  0x55   :  { %389 = vmatprep.subr.bf16.mxu1 %v558_v0  ;;  %396 = vmatpush3.bf16.msra.mxu0 %v422_v17  ;;  %p530_p8 = pnand %p529_p7, %p523_p4 }
  0x56   :  { %397 = vmatprep.subr.bf16.mxu0 %v558_v0 }
  0x58   :  { %390 = vmatpush3.bf16.msra.mxu1 %v421_v8 }
  0x59   :  { %398 = vmatpush3.bf16.msra.mxu0 %v423_v18 }
  0x5a   :  { %399 = vmatprep.subr.bf16.mxu0 %v558_v0 }
  0x5d   :  { %400 = vmatpush3.bf16.msra.mxu0 %v424_v19 }
  0x5e   :  { %401 = vmatprep.subr.bf16.mxu0 %v558_v0 }
  0x61   :  { %402 = vmatpush3.bf16.msra.mxu0 %v425_v20 }
 0x126   :  { %v144_v10 = vpop.f32.mrb[0].mxu0 }
 0x127   :  { %v145_v11 = vadd.f32 %v346_v9, %v144_v10  ;;  %v381_v12 = vpop.f32.mrb[1].mxu0 }
 0x128   :  { %v147_v13 = vpop.f32.mrb[2].mxu0 }
 0x129   :  { %426 = vtanh.f32 %v145_v11  ;;  %v382_v14 = vpop.f32.mrb[3].mxu0 }
 0x133   :  { %v427_v15 = vpop.eup %426 }
 0x134   :  { %v151_v16 = vpack.c.bf16 %v427_v15, %v427_v15 }
 0x136   :  { %392 = vmatmul.mubr.msk.bf16.vlgmr.msra.gmra.mrb[0].mxu1 %vm191_vm2, %v151_v16 }
 0x209   :  { %v229_v22 = vpop.f32.mrb[0].mxu1 }
 0x20a   :  { %v230_v23 = vadd.f32 %v350_v21, %v229_v22  ;;  %v393_v24 = vpop.f32.mrb[1].mxu1 }
 0x20b   :  { %v232_v25 = vpop.f32.mrb[2].mxu1 }
 0x20c   :  { %428 = vtanh.f32 %v230_v23  ;;  %v394_v26 = vpop.f32.mrb[3].mxu1 }
 0x216   :  { %v429_v27 = vpop.eup %428 }
 0x217   :  { %v236_v28 = vpack.c.bf16 %v429_v27, %v429_v27 }
 0x219   :  { %404 = vmatmul.mubr.msk.bf16.vlgmr.msra.gmra.mrb[4].mxu0 %vm191_vm2, %v236_v28 }
 0x2ec   :  { %v313_v30 = vpop.f32.mrb[4].mxu0 }
 0x2ed   :  { %v314_v31 = vadd.f32 %v356_v29, %v313_v30  ;;  %v405_v32 = vpop.f32.mrb[5].mxu0 }
 0x2ee   :  { %v316_v33 = vpop.f32.mrb[6].mxu0 }
 0x2ef   :  { %319 = vmax.xlane.f32.xlu0 %v314_v31  ;;  %v406_v34 = vpop.f32.mrb[7].mxu0 }
 0x37c   :  { %v320_v35 = vpop.xlane.xlu0 %319 }
 0x37d   :  { %v321_v36 = vsub.f32 %v314_v31, %v320_v35 }
 0x37f   :  { %v322_v37 = vmul.f32 1.442695, %v321_v36 }
 0x381   :  { %430 = vpow2.f32 %v322_v37 }
 0x38b   :  { %v431_v38 = vpop.eup %430 }
 0x38c   :  { %324 = vadd.xlane.f32.xlu0 %v431_v38 }
 0x419   :  { %v325_v39 = vpop.xlane.xlu0 %324 }
 0x41a   :  { %432 = vrcp.f32 %v325_v39 }
 0x424   :  { %v433_v40 = vpop.eup %432 }
 0x425   :  { %v327_v41 = vmul.f32 %v433_v40, %v431_v38 }
 0x427   :  { %328 = vst [vmem:[#allocation10] sm:$0xff] %v327_v41 }
 0x428   :  { %533 = shalt.err (!%p530_p8)
}
 0x429   :  { %s534_s8 = scalar_lea.hbm %s688_s7, 128 }
 0x42a   :  { %p535_p9 = scmp.ne.s32.totalorder %s688_s7, %s534_s8  ;;  %p538_p10 = scmp.lt.u32.totalorder %s534_s8, %s688_s7 }
 0x42c   :  { %p540_p11 = pnand %p538_p10, %p535_p9 }
 0x42e   :  { %543 = shalt.err (!%p540_p11)
}
 0x42f   :  { %338 = dma.vmem_to_hbm [thread:$0]  %s336_s28, 128, %s688_s7, [#allocation4]  }
 0x430   :  { %550 = dma.done.wait [#allocation4], 128  }
 0x431   :  { %551 = vsyncadd [#allocation4], 4294967168 }
 0x432   :  { %342 = vsyncpa [#allocation3], 1 }
 0x433   :  { %343 = vsyncpa [#allocation6], 1 }
 0x434   :  { %344 = vsyncpa [#allocation9], 1 }
 0x435   :  { %345 = vsyncpa [#allocation4], 1 }

</bundles_post_ra>
